<compile_context>
chip_gen: v6e
topology: v6e:2x2x1
jax: 0.10.0
libtpu: 0.0.40
codegen_flags: <defaults>
</compile_context>

<pallas_src>
import functools
import math

import numpy as np
import jax
import jax.numpy as jnp
from jax import lax
from jax.experimental import pallas as pl
from jax.experimental.pallas import tpu as pltpu

EPS = 1e-5  # BatchNorm eps


def _round_up(x, m):
    return (x + m - 1) // m * m


# --------------------------------------------------------------------------
# Fused matmul + BN(+act) kernel (dense and grouped-im2col variants)
# --------------------------------------------------------------------------
def _matmul_kernel(a_ref, b_ref, s_ref, d_ref, o_ref, acc_ref, *, act):
    """o = act(a @ b * scale + bias); scale/bias broadcast over rows."""
    @pl.when(pl.program_id(2) == 0)
    def _():
        acc_ref[...] = jnp.zeros_like(acc_ref)

    acc_ref[...] += jnp.dot(a_ref[...], b_ref[...],
                            preferred_element_type=jnp.float32)

    @pl.when(pl.program_id(2) == pl.num_programs(2) - 1)
    def _():
        out = acc_ref[...] * s_ref[...] + d_ref[...]
        if act == "relu":
            out = jnp.maximum(out, 0.0)
        elif act == "sigmoid":
            # NOTE: sigmoid would write 0.5 into zero-padded output columns;
            # it is intentionally never used here (SE sigmoid lives in
            # se_gate, whose padded columns are harmless downstream).
            out = jax.nn.sigmoid(out)
        o_ref[...] = out.astype(o_ref.dtype)


def matmul_fused(a, b, scale, bias, act="none", out_dtype=jnp.bfloat16):
    """act((a @ b) * scale + bias) with no XLA-side M pad/slice.

    a     : (M, K)  activations (cast to bf16 here if needed).
    b     : (Kp, Np) bf16 weights, pre-padded to 128-multiples at build time.
    scale : (1, Np) f32, bias: (1, Np) f32  (folded eval-mode BatchNorm).
    Ragged M is handled by a pl.cdiv grid + masked partial blocks; padded
    output columns are exact zeros and are kept.
    """
    M, K = a.shape
    Kp, Np = b.shape
    assert Np % 128 == 0 and Kp % 128 == 0 and K <= Kp
    a = a if a.dtype == jnp.bfloat16 else a.astype(jnp.bfloat16)
    if K < Kp:  # only the 7x7 stem (147 -> 256) can hit this
        a = jnp.pad(a, ((0, 0), (0, Kp - K)))

    # M-aware tiles: small-M calls (deep-stage 1x1 convs, final linear) are
    # weight-streaming / step-overhead bound -> wide N and deep K blocks.
    if M <= 128:
        tm = min(128, _round_up(M, 8))
        tn = next(t for t in (512, 256, 128) if Np % t == 0)
        tk = next(t for t in (1024, 512, 256, 128) if Kp % t == 0)
    else:
        tm = 256
        tn = next(t for t in (256, 128) if Np % t == 0)
        tk = next(t for t in (512, 256, 128) if Kp % t == 0)

    sliced = M < tm          # only tiny-M calls pad (at most tm-1 rows)
    if sliced:
        a = jnp.pad(a, ((0, tm - M), (0, 0)))
    Mk = a.shape[0]

    grid = (pl.cdiv(Mk, tm), Np // tn, Kp // tk)
    out = pl.pallas_call(
        functools.partial(_matmul_kernel, act=act),
        out_shape=jax.ShapeDtypeStruct((Mk, Np), out_dtype),
        grid_spec=pltpu.PrefetchScalarGridSpec(
            num_scalar_prefetch=0,
            grid=grid,
            in_specs=[
                pl.BlockSpec((tm, tk), lambda i, j, k: (i, k)),
                pl.BlockSpec((tk, tn), lambda i, j, k: (k, j)),
                pl.BlockSpec((1, tn), lambda i, j, k: (0, j)),
                pl.BlockSpec((1, tn), lambda i, j, k: (0, j)),
            ],
            out_specs=pl.BlockSpec((tm, tn), lambda i, j, k: (i, j)),
            scratch_shapes=[pltpu.VMEM((tm, tn), jnp.float32)],
        ),
        compiler_params=pltpu.CompilerParams(
            dimension_semantics=("parallel", "parallel", "arbitrary")),
    )(a, b, scale, bias)
    return out[:M] if sliced else out


def grouped_matmul_fused(a, b, scale, bias, cin, act="none",
                         out_dtype=jnp.bfloat16):
    """Grouped (groups=32) 3x3 conv as a matmul that skips structural zeros.

    Used only for the 3 stride-2 conv2 blocks (which still go through XLA
    im2col).  a: (M, 9*cin) patches in (kh, kw, cin) order, cin % 128 == 0.
    b: (9*128, Np) compact weight; A's K index_map depends on the output tile
    j so only that tile's 128 input channels are ever loaded/multiplied.
    """
    M, K = a.shape
    Kb, Np = b.shape
    assert cin % 128 == 0 and Np % 128 == 0
    nk = Kb // 128                  # kernel positions (9)
    assert K == nk * cin
    cpt = cin // 128                # A K-blocks between kernel positions
    a = a if a.dtype == jnp.bfloat16 else a.astype(jnp.bfloat16)

    tm = min(256, _round_up(M, 8))
    sliced = M < tm
    if sliced:
        a = jnp.pad(a, ((0, tm - M), (0, 0)))
    Mk = a.shape[0]

    grid = (pl.cdiv(Mk, tm), Np // 128, nk)
    out = pl.pallas_call(
        functools.partial(_matmul_kernel, act=act),
        out_shape=jax.ShapeDtypeStruct((Mk, Np), out_dtype),
        grid_spec=pltpu.PrefetchScalarGridSpec(
            num_scalar_prefetch=0,
            grid=grid,
            in_specs=[
                # position k, input channels [j*128, (j+1)*128)
                pl.BlockSpec((tm, 128), lambda i, j, k: (i, k * cpt + j)),
                pl.BlockSpec((128, 128), lambda i, j, k: (k, j)),
                pl.BlockSpec((1, 128), lambda i, j, k: (0, j)),
                pl.BlockSpec((1, 128), lambda i, j, k: (0, j)),
            ],
            out_specs=pl.BlockSpec((tm, 128), lambda i, j, k: (i, j)),
            scratch_shapes=[pltpu.VMEM((tm, 128), jnp.float32)],
        ),
        compiler_params=pltpu.CompilerParams(
            dimension_semantics=("parallel", "parallel", "arbitrary")),
    )(a, b, scale, bias)
    return out[:M] if sliced else out


# --------------------------------------------------------------------------
# Fused stride-1 grouped 3x3 conv (no im2col materialization in HBM)
# --------------------------------------------------------------------------
def _gconv3x3_kernel(x_ref, w_ref, s_ref, d_ref, o_ref, *, wpad, mc, act):
    """One batch element, one 128-channel group-aligned slab.

    x_ref : (1, (H+3)*wpad, 128) f32 flattened zero-padded canvas.
    w_ref : (9*128, 128) bf16 compact grouped weight (position-major rows).
    o_ref : (1, mc, 128) output canvas rows (2 garbage cols per image row,
            stripped by the caller).  All 9 taps computed in-VMEM as 3 MXU
            dots of K=384 (kernel-row packing).
    """
    TM = 128
    n_sub = (mc + TM - 1) // TM
    for t in range(n_sub):                       # static unrolled loop
        m0 = t * TM
        m = min(TM, mc - m0)
        acc = jnp.zeros((m, 128), jnp.float32)
        for ki in range(3):
            a = jnp.concatenate(
                [x_ref[0, pl.ds(m0 + ki * wpad + kj, m), :]
                 .astype(jnp.bfloat16) for kj in range(3)],
                axis=-1)                         # (m, 384) bf16
            acc += jnp.dot(a, w_ref[pl.ds(ki * 384, 384), :],
                           preferred_element_type=jnp.float32)
        out = acc * s_ref[...] + d_ref[...]
        if act == "relu":
            out = jnp.maximum(out, 0.0)
        o_ref[0, pl.ds(m0, m), :] = out.astype(o_ref.dtype)


def gconv3x3_s1_fused(x, layer, act="relu"):
    """Fused 3x3 / stride-1 / groups=32 conv + BN + act, NHWC in/out."""
    B, H, W, C = x.shape
    kb, Np = layer["w"].shape
    assert layer["kh"] == 3 and layer["kw"] == 3
    assert layer["stride"] == 1 and layer["pad"] == 1
    assert C == Np and C % 128 == 0 and kb == 9 * 128

    wpad = W + 2
    mc = H * wpad                     # output canvas rows per batch element
    lin = (H + 3) * wpad              # padded input canvas rows
    # zero-pad 1 row top / 2 rows bottom / 1 col each side; keep the canvas in
    # f32 so the in-kernel row-offset loads stay on the unpacked layout path.
    xp = jnp.pad(x.astype(jnp.float32), ((0, 0), (1, 2), (1, 1), (0, 0)))
    xflat = xp.reshape(B, lin, C)

    out = pl.pallas_call(
        functools.partial(_gconv3x3_kernel, wpad=wpad, mc=mc, act=act),
        out_shape=jax.ShapeDtypeStruct((B, mc, Np), jnp.bfloat16),
        grid_spec=pltpu.PrefetchScalarGridSpec(
            num_scalar_prefetch=0,
            grid=(B, Np // 128),
            in_specs=[
                pl.BlockSpec((1, lin, 128), lambda b, j: (b, 0, j)),
                pl.BlockSpec((kb, 128), lambda b, j: (0, j)),
                pl.BlockSpec((1, 128), lambda b, j: (0, j)),
                pl.BlockSpec((1, 128), lambda b, j: (0, j)),
            ],
            out_specs=pl.BlockSpec((1, mc, 128), lambda b, j: (b, 0, j)),
        ),
        compiler_params=pltpu.CompilerParams(
            dimension_semantics=("parallel", "parallel")),
    )(xflat, layer["w"], layer["scale"], layer["bias"])
    # strip the 2 garbage columns appended to every image row by the canvas
    return out.reshape(B, H, wpad, Np)[:, :, :W, :]


# --------------------------------------------------------------------------
# Global average pool and SE scale+residual+ReLU (big lane-dense blocks)
# --------------------------------------------------------------------------
def _avgpool_kernel(x_ref, o_ref, *, inv_n, total_rows):
    s = pl.program_id(1)

    @pl.when(s == 0)
    def _():
        o_ref[...] = jnp.zeros_like(o_ref)

    x = x_ref[0].astype(jnp.float32)                 # (ts, C)
    ts = x.shape[0]
    if total_rows % ts != 0:                         # static: ragged last tile
        rows = s * ts + lax.broadcasted_iota(jnp.int32, (ts, 1), 0)
        x = jnp.where(rows < total_rows, x, 0.0)
    o_ref[0] += jnp.sum(x, axis=0, keepdims=True)

    @pl.when(s == pl.num_programs(1) - 1)
    def _():
        o_ref[...] = o_ref[...] * inv_n


def global_avg_pool(x):
    """(B, H, W, C) NHWC -> (B, C) f32 mean."""
    B, H, W, C = x.shape
    S = H * W
    cap = max(8, (2 * 1024 * 1024) // (C * x.dtype.itemsize) // 8 * 8)
    ts = S if S <= cap else cap                      # full-S when it fits
    out = pl.pallas_call(
        functools.partial(_avgpool_kernel, inv_n=1.0 / float(S),
                          total_rows=S),
        out_shape=jax.ShapeDtypeStruct((B, 1, C), jnp.float32),
        grid_spec=pltpu.PrefetchScalarGridSpec(
            num_scalar_prefetch=0,
            grid=(B, pl.cdiv(S, ts)),
            in_specs=[pl.BlockSpec((1, ts, C), lambda b, s: (b, s, 0))],
            out_specs=pl.BlockSpec((1, 1, C), lambda b, s: (b, 0, 0)),
        ),
        compiler_params=pltpu.CompilerParams(
            dimension_semantics=("parallel", "arbitrary")),
    )(x.reshape(B, S, C))
    return out.reshape(B, C)


def _se_res_relu_kernel(x_ref, g_ref, r_ref, o_ref):
    x = x_ref[...].astype(jnp.float32)
    g = g_ref[...].astype(jnp.float32)
    r = r_ref[...].astype(jnp.float32)
    o_ref[...] = jnp.maximum(x * g + r, 0.0).astype(o_ref.dtype)


def se_scale_residual_relu(x, gate, residual):
    """relu(x * gate + residual); gate is (B, C)."""
    B, H, W, C = x.shape
    S = H * W
    cap = max(8, (2 * 1024 * 1024) // (C * 2) // 8 * 8)
    ts = S if S <= cap else cap
    out = pl.pallas_call(
        _se_res_relu_kernel,
        out_shape=jax.ShapeDtypeStruct((B, S, C), x.dtype),
        grid_spec=pltpu.PrefetchScalarGridSpec(
            num_scalar_prefetch=0,
            grid=(B, pl.cdiv(S, ts)),
            in_specs=[
                pl.BlockSpec((1, ts, C), lambda b, s: (b, s, 0)),
                pl.BlockSpec((1, 1, C), lambda b, s: (b, 0, 0)),
                pl.BlockSpec((1, ts, C), lambda b, s: (b, s, 0)),
            ],
            out_specs=pl.BlockSpec((1, ts, C), lambda b, s: (b, s, 0)),
        ),
        compiler_params=pltpu.CompilerParams(
            dimension_semantics=("parallel", "parallel")),
    )(x.reshape(B, S, C), gate.reshape(B, 1, C), residual.reshape(B, S, C))
    return out.reshape(B, H, W, C)


def _se_fc_kernel(p_ref, w1_ref, b1_ref, w2_ref, b2_ref, o_ref):
    # gate = sigmoid(fc2(relu(fc1(pooled)))) fully in VMEM (tiny matmuls).
    p = p_ref[...].astype(jnp.bfloat16)
    h = jnp.dot(p, w1_ref[...], preferred_element_type=jnp.float32) + b1_ref[...]
    h = jnp.maximum(h, 0.0).astype(jnp.bfloat16)
    g = jnp.dot(h, w2_ref[...], preferred_element_type=jnp.float32) + b2_ref[...]
    o_ref[...] = jax.nn.sigmoid(g).astype(o_ref.dtype)


def se_gate(pooled, fc1, fc2):
    """Fused SE MLP.  pooled: (B, C) f32 -> gate (B, C) bf16."""
    B, C = pooled.shape
    Mp = _round_up(B, 8)
    p = pooled if Mp == B else jnp.pad(pooled, ((0, Mp - B), (0, 0)))
    out = pl.pallas_call(
        _se_fc_kernel,
        out_shape=jax.ShapeDtypeStruct((Mp, C), jnp.bfloat16),
    )(p, fc1["w"], fc1["bias"], fc2["w"], fc2["bias"])
    return out[:B]


# --------------------------------------------------------------------------
# JAX glue: im2col (stem + stride-2 convs only) + ceil-mode max pool
# --------------------------------------------------------------------------
def im2col(x, kh, kw, stride, pad, k_pad_to=None):
    """NHWC -> (B*OH*OW, K) patches, row-major over (kh, kw, C).

    k_pad_to appends zero columns inside the concat (no second pad pass)."""
    B, H, W, C = x.shape
    if pad:
        x = jnp.pad(x, ((0, 0), (pad, pad), (pad, pad), (0, 0)))
    OH = (H + 2 * pad - kh) // stride + 1
    OW = (W + 2 * pad - kw) // stride + 1
    cols = []
    for i in range(kh):
        for j in range(kw):
            sl = lax.slice(
                x, (0, i, j, 0),
                (B, i + (OH - 1) * stride + 1, j + (OW - 1) * stride + 1, C),
                (1, stride, stride, 1))
            cols.append(sl)
    K = kh * kw * C
    if k_pad_to is not None and k_pad_to > K:
        cols.append(jnp.zeros((B, OH, OW, k_pad_to - K), x.dtype))
        K = k_pad_to
    patches = cols[0] if len(cols) == 1 else jnp.concatenate(cols, axis=-1)
    return patches.reshape(B * OH * OW, K), OH, OW


def max_pool_3x3_s2_ceil(x):
    # PyTorch nn.MaxPool2d(3, stride=2, ceil_mode=True): XLA reduce_window.
    B, H, W, C = x.shape
    OH = -(-(H - 3) // 2) + 1
    OW = -(-(W - 3) // 2) + 1
    assert (OH - 1) * 2 < H and (OW - 1) * 2 < W
    ph = max(0, (OH - 1) * 2 + 3 - H)
    pw = max(0, (OW - 1) * 2 + 3 - W)
    neg_inf = jnp.array(-jnp.inf, dtype=x.dtype)
    return lax.reduce_window(x, neg_inf, lax.max,
                             (1, 3, 3, 1), (1, 2, 2, 1),
                             ((0, 0), (0, ph), (0, pw), (0, 0)))


# --------------------------------------------------------------------------
# Deterministic parameter construction (PyTorch-shaped, pre-converted for TPU)
# --------------------------------------------------------------------------
class ParamBuilder:
    def __init__(self, seed=0):
        self.rng = np.random.RandomState(seed)

    def _bn_scale_bias(self, cout, coutp):
        gamma = self.rng.uniform(0.8, 1.2, cout).astype(np.float32)
        beta = self.rng.normal(0.0, 0.05, cout).astype(np.float32)
        mean = np.zeros(cout, np.float32)
        var = np.ones(cout, np.float32)
        scale = gamma / np.sqrt(var + EPS)
        bias = beta - mean * scale
        s = np.zeros((1, coutp), np.float32)
        d = np.zeros((1, coutp), np.float32)
        s[0, :cout] = scale
        d[0, :cout] = bias
        return jnp.asarray(s), jnp.asarray(d)

    def conv_bn(self, cin, cout, kh, kw, stride, pad, groups=1):
        cin_g = cin // groups
        fan_in = cin_g * kh * kw
        w = self.rng.normal(0.0, math.sqrt(2.0 / fan_in),
                            (cout, cin_g, kh, kw)).astype(np.float32)
        w = np.transpose(w, (2, 3, 1, 0))           # (kh, kw, cin_g, cout)
        coutp = _round_up(cout, 128)
        if groups == 1:
            K = kh * kw * cin
            Kp = _round_up(K, 128)
            w2d = np.zeros((Kp, coutp), np.float32)
            w2d[:K, :cout] = w.reshape(K, cout)
        else:
            # Compact grouped layout shared by gconv3x3_s1_fused and
            # grouped_matmul_fused: only the 128-input-channel slab feeding
            # each 128-wide output tile is stored (position-major rows).
            assert cin % 128 == 0 and cout % 128 == 0
            cout_g = cout // groups
            assert cin_g == cout_g                  # true for ResNeXt conv2
            gpt = 128 // cout_g                     # groups per output tile
            w2d = np.zeros((kh * kw * 128, coutp), np.float32)
            for nt in range(cout // 128):
                for gg in range(gpt):
                    g = nt * gpt + gg
                    for p in range(kh * kw):
                        ki, kj = divmod(p, kw)
                        w2d[p * 128 + gg * cin_g: p * 128 + (gg + 1) * cin_g,
                            g * cout_g:(g + 1) * cout_g] = \
                            w[ki, kj, :, g * cout_g:(g + 1) * cout_g]
        s, d = self._bn_scale_bias(cout, coutp)
        return dict(w=jnp.asarray(w2d, dtype=jnp.bfloat16), scale=s, bias=d,
                    kh=kh, kw=kw, stride=stride, pad=pad, groups=groups,
                    cin=cin)

    def fc(self, cin, cout):
        cinp = _round_up(cin, 128)
        coutp = _round_up(cout, 128)
        w = self.rng.normal(0.0, math.sqrt(1.0 / cin),
                            (cout, cin)).astype(np.float32)
        b = self.rng.normal(0.0, 0.01, cout).astype(np.float32)
        w2d = np.zeros((cinp, coutp), np.float32)
        w2d[:cin, :cout] = w.T
        bias = np.zeros((1, coutp), np.float32)
        bias[0, :cout] = b
        scale = np.ones((1, coutp), np.float32)
        return dict(w=jnp.asarray(w2d, dtype=jnp.bfloat16),
                    bias=jnp.asarray(bias), scale=jnp.asarray(scale))


def build_params(seed=0):
    pb = ParamBuilder(seed)
    params = {"layer0": pb.conv_bn(3, 64, 7, 7, stride=2, pad=3)}
    inplanes = 64
    stages = []
    # se_resnext50_32x4d: layers=[3,4,6,3], groups=32, base_width=4, red.=16
    for planes, blocks, stride in [(64, 3, 1), (128, 4, 2),
                                   (256, 6, 2), (512, 3, 2)]:
        stage = []
        for b in range(blocks):
            s = stride if b == 0 else 1
            width = (planes * 4 // 64) * 32
            blk = {
                "conv1": pb.conv_bn(inplanes, width, 1, 1, 1, 0),
                "conv2": pb.conv_bn(width, width, 3, 3, s, 1, groups=32),
                "conv3": pb.conv_bn(width, planes * 4, 1, 1, 1, 0),
                "se_fc1": pb.fc(planes * 4, planes * 4 // 16),
                "se_fc2": pb.fc(planes * 4 // 16, planes * 4),
            }
            if b == 0 and (s != 1 or inplanes != planes * 4):
                blk["down"] = pb.conv_bn(inplanes, planes * 4, 1, 1, s, 0)
            stage.append(blk)
            inplanes = planes * 4
        stages.append(stage)
    params["stages"] = stages
    params["last_linear"] = pb.fc(2048, 1)
    return params


# --------------------------------------------------------------------------
# Forward pass
# --------------------------------------------------------------------------
def conv_bn_forward(x, layer, act):
    if layer["groups"] != 1 and layer["stride"] == 1:
        # 13 of 16 grouped 3x3 convs: fused, no im2col materialization.
        return gconv3x3_s1_fused(x, layer, act=act)
    k_pad_to = None
    if layer["groups"] == 1:
        K = layer["kh"] * layer["kw"] * x.shape[-1]
        Kp = layer["w"].shape[0]
        k_pad_to = Kp if Kp > K else None
    patches, OH, OW = im2col(x, layer["kh"], layer["kw"], layer["stride"],
                             layer["pad"], k_pad_to=k_pad_to)
    if layer["groups"] == 1:
        out = matmul_fused(patches, layer["w"], layer["scale"], layer["bias"],
                           act=act)
    else:
        # TODO(synk): the 3 stride-2 grouped convs still use a 9x im2col;
        # fuse them via stride-2 canvas loads like the stride-1 path.
        out = grouped_matmul_fused(patches, layer["w"], layer["scale"],
                                   layer["bias"], cin=layer["cin"], act=act)
    return out.reshape(x.shape[0], OH, OW, out.shape[1])


def bottleneck_forward(x, blk):
    residual = x
    out = conv_bn_forward(x, blk["conv1"], act="relu")
    out = conv_bn_forward(out, blk["conv2"], act="relu")
    out = conv_bn_forward(out, blk["conv3"], act="none")
    pooled = global_avg_pool(out)                          # (B, C) f32
    gate = se_gate(pooled, blk["se_fc1"], blk["se_fc2"])   # (B, C) bf16
    if "down" in blk:
        residual = conv_bn_forward(x, blk["down"], act="none")
    return se_scale_residual_relu(out, gate, residual)


def seresnext50_forward(params, x_nchw):
    # PyTorch module input is NCHW f32; convert once to NHWC bf16.
    x = jnp.transpose(x_nchw, (0, 2, 3, 1)).astype(jnp.bfloat16)
    x = conv_bn_forward(x, params["layer0"], act="relu")   # 7x7/s2 + BN + ReLU
    x = max_pool_3x3_s2_ceil(x)                            # 3x3/s2, ceil_mode
    for stage in params["stages"]:
        for blk in stage:
            x = bottleneck_forward(x, blk)
    feature = global_avg_pool(x)                           # (B, 2048) f32
    ll = params["last_linear"]
    logits = matmul_fused(feature, ll["w"], ll["scale"], ll["bias"],
                          act="none", out_dtype=jnp.float32)[:, :1]
    return feature, logits


# --------------------------------------------------------------------------
if __name__ == "__main__":
    key = jax.random.PRNGKey(0)
    # Small but architecture-consistent input: NCHW, 3 channels, 64x64 spatial
    # (the network downsamples by 32x, giving a 2x2 map before the final pool).
    x = jax.random.normal(key, (2, 3, 64, 64), dtype=jnp.float32)

    params = build_params(seed=0)
    feature, out = seresnext50_forward(params, x)
    jax.block_until_ready((feature, out))

    assert feature.shape == (2, 2048), feature.shape
    assert out.shape == (2, 1), out.shape
    assert feature.dtype == jnp.float32 and out.dtype == jnp.float32
    assert bool(jnp.all(jnp.isfinite(feature))) and bool(jnp.all(jnp.isfinite(out)))
    print("KERNEL_OK")
</pallas_src>

<mosaic_0001>
module attributes {stable_mosaic.version = 11 : i64} {
  func.func @_matmul_kernel(%arg0: i32, %arg1: i32, %arg2: i32, %arg3: memref<256x256xbf16, #tpu.memory_space<vmem>>, %arg4: memref<256x128xbf16, #tpu.memory_space<vmem>>, %arg5: memref<1x128xf32, #tpu.memory_space<vmem>>, %arg6: memref<1x128xf32, #tpu.memory_space<vmem>>, %arg7: memref<256x128xbf16, #tpu.memory_space<vmem>>, %arg8: memref<256x128xf32, #tpu.memory_space<vmem>>) attributes {dimension_semantics = [#tpu.dimension_semantics<parallel>, #tpu.dimension_semantics<parallel>, #tpu.dimension_semantics<arbitrary>], iteration_bounds = array<i64: 8, 1, 1>, scalar_prefetch = 0 : i64, scratch_operands = 1 : i64, tpu.core_type = #tpu.core_type<tc>, window_params = [{transform_indices = @transform_0, window_bounds = array<i64: 256, 256>}, {transform_indices = @transform_1, window_bounds = array<i64: 256, 128>}, {transform_indices = @transform_2, window_bounds = array<i64: 1, 128>}, {transform_indices = @transform_3, window_bounds = array<i64: 1, 128>}, {transform_indices = @transform_4, window_bounds = array<i64: 256, 128>}]} {
    %c0_i32 = arith.constant 0 : i32
    %0 = arith.cmpi eq, %arg2, %c0_i32 : i32
    %1 = arith.extui %0 : i1 to i32
    %c0_i32_0 = arith.constant 0 : i32
    %2 = arith.cmpi ne, %1, %c0_i32_0 : i32
    scf.if %2 {
      %cst_10 = arith.constant 0.000000e+00 : f32
      %12 = vector.broadcast %cst_10 : f32 to vector<256x128xf32>
      %c0_11 = arith.constant 0 : index
      %c0_12 = arith.constant 0 : index
      %13 = vector.load %arg8[%c0_11, %c0_12] : memref<256x128xf32, #tpu.memory_space<vmem>>, vector<256x128xf32>
      tpu.vector_store %arg8[%c0_11, %c0_12], %12 {strides = array<i32>} : memref<256x128xf32, #tpu.memory_space<vmem>>, vector<256x128xf32>,
    } else {
    }
    %c0 = arith.constant 0 : index
    %c0_1 = arith.constant 0 : index
    %3 = vector.load %arg8[%c0, %c0_1] : memref<256x128xf32, #tpu.memory_space<vmem>>, vector<256x128xf32>
    %c0_2 = arith.constant 0 : index
    %c0_3 = arith.constant 0 : index
    %4 = vector.load %arg3[%c0_2, %c0_3] : memref<256x256xbf16, #tpu.memory_space<vmem>>, vector<256x256xbf16>
    %c0_4 = arith.constant 0 : index
    %c0_5 = arith.constant 0 : index
    %5 = vector.load %arg4[%c0_4, %c0_5] : memref<256x128xbf16, #tpu.memory_space<vmem>>, vector<256x128xbf16>
    %cst = arith.constant dense<0.000000e+00> : vector<256x128xf32>
    %6 = tpu.matmul %4, %5, %cst {dimension_numbers = #tpu.dot_dimension_numbers<[1], [0], [0], [1], [0, 0, 1, 1], [], []>} : vector<256x256xbf16>, vector<256x128xbf16>, vector<256x128xf32> -> vector<256x128xf32>
    %7 = arith.addf %3, %6 : vector<256x128xf32>
    %c0_6 = arith.constant 0 : index
    %c0_7 = arith.constant 0 : index
    %8 = vector.load %arg8[%c0_6, %c0_7] : memref<256x128xf32, #tpu.memory_space<vmem>>, vector<256x128xf32>
    tpu.vector_store %arg8[%c0_6, %c0_7], %7 {strides = array<i32>} : memref<256x128xf32, #tpu.memory_space<vmem>>, vector<256x128xf32>,
    %c0_i32_8 = arith.constant 0 : i32
    %9 = arith.cmpi eq, %arg2, %c0_i32_8 : i32
    %10 = arith.extui %9 : i1 to i32
    %c0_i32_9 = arith.constant 0 : i32
    %11 = arith.cmpi ne, %10, %c0_i32_9 : i32
    scf.if %11 {
      %c0_10 = arith.constant 0 : index
      %c0_11 = arith.constant 0 : index
      %12 = vector.load %arg8[%c0_10, %c0_11] : memref<256x128xf32, #tpu.memory_space<vmem>>, vector<256x128xf32>
      %c0_12 = arith.constant 0 : index
      %c0_13 = arith.constant 0 : index
      %13 = vector.load %arg5[%c0_12, %c0_13] : memref<1x128xf32, #tpu.memory_space<vmem>>, vector<1x128xf32>
      %14 = vector.broadcast %13 : vector<1x128xf32> to vector<256x128xf32>
      %15 = arith.mulf %12, %14 : vector<256x128xf32>
      %c0_14 = arith.constant 0 : index
      %c0_15 = arith.constant 0 : index
      %16 = vector.load %arg6[%c0_14, %c0_15] : memref<1x128xf32, #tpu.memory_space<vmem>>, vector<1x128xf32>
      %17 = vector.broadcast %16 : vector<1x128xf32> to vector<256x128xf32>
      %18 = arith.addf %15, %17 : vector<256x128xf32>
      %cst_16 = arith.constant 0.000000e+00 : f32
      %19 = vector.broadcast %cst_16 : f32 to vector<256x128xf32>
      %20 = arith.maximumf %18, %19 : vector<256x128xf32>
      %21 = arith.truncf %20 : vector<256x128xf32> to vector<256x128xbf16>
      %c0_17 = arith.constant 0 : index
      %c0_18 = arith.constant 0 : index
      %22 = vector.load %arg7[%c0_17, %c0_18] : memref<256x128xbf16, #tpu.memory_space<vmem>>, vector<256x128xbf16>
      tpu.vector_store %arg7[%c0_17, %c0_18], %21 {strides = array<i32>} : memref<256x128xbf16, #tpu.memory_space<vmem>>, vector<256x128xbf16>,
    } else {
    }
    return
  }
  func.func @transform_0(%arg0: i32, %arg1: i32, %arg2: i32) -> (i32, i32) {
    %c0_i32 = arith.constant 0 : i32
    return %arg0, %arg2 : i32, i32
  }
  func.func @transform_1(%arg0: i32, %arg1: i32, %arg2: i32) -> (i32, i32) {
    %c0_i32 = arith.constant 0 : i32
    return %arg2, %arg1 : i32, i32
  }
  func.func @transform_2(%arg0: i32, %arg1: i32, %arg2: i32) -> (i32, i32) {
    %c0_i32 = arith.constant 0 : i32
    %c0_i32_0 = arith.constant 0 : i32
    return %c0_i32, %arg1 : i32, i32
  }
  func.func @transform_3(%arg0: i32, %arg1: i32, %arg2: i32) -> (i32, i32) {
    %c0_i32 = arith.constant 0 : i32
    %c0_i32_0 = arith.constant 0 : i32
    return %c0_i32, %arg1 : i32, i32
  }
  func.func @transform_4(%arg0: i32, %arg1: i32, %arg2: i32) -> (i32, i32) {
    %c0_i32 = arith.constant 0 : i32
    return %arg0, %arg1 : i32, i32
  }
}

</mosaic_0001>

<bundles_post_ra>
// kernel: tpu_custom_call.1
= control target key start
LH: loop header
LB: loop body
LE: loop exit
PB: predicated region body
PF: predicated region fallthrough
CT: control target
= control target key end

     0   :  { %s2345_s0 = inlined_call_operand.hbm [shape: bf16[2048,256], index: 0, kind: input, shape index: {}]   ;;  %s2346_s1 = inlined_call_operand.hbm [shape: bf16[256,128], index: 1, kind: input, shape index: {}]   ;;  %s2347_s2 = inlined_call_operand.vmem [shape: f32[1,128], index: 2, kind: input, shape index: {}]   ;;  %s2348_s3 = inlined_call_operand.vmem [shape: f32[1,128], index: 3, kind: input, shape index: {}]   ;;  %s2349_s4 = inlined_call_operand.hbm [shape: bf16[2048,128], index: 4, kind: output, shape index: {}]  }
   0x1   :  { %2351 = sst [smem:[#allocation12_spill]] %s2346_s1 }
   0x2   :  { %9 = vsyncpa [#allocation4], 0 }
   0x3   :  { %11 = vsyncpa [#allocation4 + $0x1], 0 }
   0x4   :  { %12 = vsyncpa [#allocation7], 0 }
   0x5   :  { %13 = vsyncpa [#allocation5], 0 }
   0x6   :  { %15 = vsyncpa [#allocation5 + $0x1], 0  ;;  %s2038_s15 = smov 0   ;;  %s2040_s16 = smov 0  }
   0x7   :  { %s2042_s17 = smov 0   ;;  %s2044_s18 = smov 0  }
   0x8   :  { %s2046_s19 = smov 0   ;;  %s2048_s20 = smov 0  }
   0x9 LB: > { %s1361_s21 = sadd.s32 4294967295, %s2002_s20   ;;  %s1362_s22 = sadd.s32 4294967294, %s2002_s20   ;;  %s2002_s20 = sphi %s2048_s20, %s21_s20   ;;  %s1998_s19 = sphi %s2046_s19, %s2368_s19   ;;  %s1994_s18 = sphi %s2044_s18, %s2367_s18   ;;  %s1990_s17 = sphi %s2042_s17, %s2366_s17   ;;  %s1986_s16 = sphi %s2040_s16, %s2365_s16   ;;  %s1982_s15 = sphi %s2038_s15, %s2364_s15  }
   0xa   : > { %p62_p0 = scmp.ne.s32.totalorder %s1986_s16, %s1982_s15  ;;  %p2072_p1 = scmp.eq.s32.totalorder %s1361_s21, 0 }
   0xb   : > { %p2076_p2 = scmp.eq.s32.totalorder %s1361_s21, 7  ;;  %p174_p3 = scmp.eq.s32.totalorder %s1362_s22, 7 }
   0xc   : > { %p2082_p4 = por %p2072_p1, %p62_p0  ;;  %p1363_p5 = scmp.ge.s32.totalorder %s2002_s20, 1 }
   0xd   : > { %p2087_p6 = por %p174_p3, %p62_p0  ;;  %p181_p7 = scmp.lt.s32.totalorder %s2002_s20, 9 }
   0xe   : > { %s2004_s28 = smov [#allocation6]   ;;  %s40_s5 = sadd.s32 1, %s1998_s19 }
   0xf   : > { %s2355_s26 = scalar_select %p2087_p6, 1, 0 }
  0x10   : > { %p2092_p8 = pnand %p1363_p5, %p181_p7  ;;  %s197_s29 = sshll.u32 %s2004_s28, 4  ;;  %s198_s29 = int_to_ptr.vmem [resolvable:$true] %s197_s29 }
  0x11   : > { %s1875_s6 = scalar_lea.vmem %s198_s29, 2048  ;;  %p1883_p3 = scmp.lt.s32.totalorder %s198_s29, %s198_s29 }
  0x12   : > { %p1729_p9 = pneg %p2092_p8  ;;  %p1876_p12 = scmp.ne.s32.totalorder %s198_s29, %s1875_s6 }
  0x13   : > { %p1884_p5 = scmp.lt.s32.totalorder %s1875_s6, %s1875_s6 }
  0x14   : > { %p2100_p10 = pnand %p1729_p9, %p2072_p1 }
  0x15   : > { %p1885_p7 = por %p1884_p5, %p1883_p3 }
  0x16   : > { %p1866_p11 = pneg %p2100_p10 }
  0x18   : > { %p1878_p13 = pnand %p1876_p12, %p1866_p11 }
  0x1a   : > { %p1879_p0 = pneg %p1878_p13 }
  0x1c   : > { %p1886_p6 = pnand %p1885_p7, %p1879_p0 }
  0x1e   : > { %1889 = shalt.err (!%p1886_p6)
}
  0x1f   : > { %s2005_s7 = smov 64   ;;  %s2006_s8 = smov 4  }
  0x20   : > { %s2358_s1 = sld [smem:[#allocation12_spill]]  ;;  %p42_p9 = scmp.ge.s32.totalorder %s40_s5, 8 }
  0x21   : > { %s49_s11 = sadd.s32 1, %s1990_s17  ;;  %p56_p6 = scmp.ne.s32.totalorder %s1990_s17, %s1986_s16 }
  0x22   : > { %p57_p11 = scmp.eq.s32.totalorder %s2002_s20, 0  ;;  %s2370_s5 = smov (%p42_p9, %s40_s5), 0 }
  0x23   : > { %p2124_p13 = por %p2076_p2, %p56_p6  ;;  %s44_s14 = ssub.s32 %s1998_s19, %s2370_s5 }
  0x24   : > { %p2118_p12 = por %p57_p11, %p56_p6  ;;  %p1742_p0 = scmp.lt.s32.totalorder %s2002_s20, 8 }
  0x25   : > { %s2360_s13 = scalar_select %p2124_p13, 1, 0 }
  0x26   : > { %1732 = dma.hbm_to_vmem [thread:$0]  (!%p2100_p10), %s2358_s1, 2048, %s198_s29, [#allocation7], %s2005_s7, %s2005_s7, %s2006_s8  }
  0x27   : > { %p47_p10 = scmp.eq.s32.totalorder %s44_s14, 0  ;;  %s223_s21 = sand.u32 1, %s1990_s17  }
  0x28   : > { %s1368_s22 = sshll.u32 %s223_s21, 8  ;;  %s1464_s29 = sshll.u32 %s1998_s19, 12 }
  0x29   : > { %s2133_s28 = scalar_select %p47_p10, %s1990_s17, %s49_s11  }
  0x2a   : > { %s236_s7 = scalar_lea.hbm %s2345_s0, %s1464_s29  ;;  %s227_s8 = scalar_lea.vmem [#allocation3], %s1368_s22 }
  0x2b   : > { %s237_s9 = sshll.u32 %s227_s8, 4  ;;  %p2141_p2 = pnand %p1742_p0, %p2118_p12  ;;  %s238_s9 = int_to_ptr.vmem [resolvable:$true] %s237_s9 }
  0x2c   : > { %s224_s10 = scalar_lea.sflag [#allocation4], %s223_s21  ;;  %s1903_s14 = scalar_lea.vmem %s238_s9, 4096 }
  0x2d   : > { %p1892_p3 = pneg %p2141_p2  ;;  %p1904_p5 = scmp.ne.s32.totalorder %s238_s9, %s1903_s14 }
  0x2e   : > { %s2007_s11 = smov [#allocation3]  }
  0x2f   : > { %p1906_p7 = pnand %p1904_p5, %p1892_p3  ;;  %s1908_s1 = sshll.u32 %s2007_s11, 4  ;;  %s1909_s1 = int_to_ptr.vmem [resolvable:$false] %s1908_s1 }
  0x30   : > { %s1910_s29 = scalar_lea.vmem %s1909_s1, 8192  ;;  %p1911_p6 = scmp.lt.s32.totalorder %s238_s9, %s1909_s1 }
  0x31   : > { %p1907_p9 = pneg %p1906_p7  ;;  %p1912_p11 = scmp.lt.s32.totalorder %s1910_s29, %s1903_s14 }
  0x33   : > { %p1913_p10 = por %p1912_p11, %p1911_p6 }
  0x35   : > { %p1914_p13 = pnand %p1913_p10, %p1907_p9 }
  0x37   : > { %1917 = shalt.err (!%p1914_p13)
}
  0x38   : > { %s2008_s12 = smov 128   ;;  %s2009_s22 = smov 8  }
  0x39   : > { %1736 = dma.hbm_to_vmem [thread:$0]  (!%p2141_p2), %s236_s7, 4096, %s238_s9, %s224_s10, %s2008_s12, %s2008_s12, %s2009_s22  }
  0x3a   : > { %249 = sbr.rel (%p2092_p8) target bundleno = 378 (0x17a), region = 36  ;;  %s2152_s21 = sand.u32 (!%p2092_p8), 1, %s1986_s16  }
  0x3b   : > { %s1373_s30 = sshll.u32 (!%p2092_p8), %s2152_s21, 8  ;;  %s252_s1 = scalar_lea.sflag (!%p2092_p8), [#allocation4], %s2152_s21 }
  0x3c   : > { %s2156_s6 = scalar_lea.vmem (!%p2092_p8), [#allocation3], %s1373_s30 }
  0x3f   : > { %1969 = dma.done.wait (%p2082_p4), %s252_s1, 4096  }
  0x40   : > { %1971 = vsyncadd (%p2082_p4), %s252_s1, 4294963200 }
  0x41   : > { %1973 = dma.done.wait (%p2072_p1), [#allocation7], 2048  }
  0x42   : > { %1975 = vsyncadd (%p2072_p1), [#allocation7], 4294965248  ;;  %v1800_v0 = vld [vmem:[#allocation6 + $0x78] sm:$0xff]   ;;  %v1802_v2 = vld [vmem:[#allocation6 + $0x70] sm:$0xff]   ;;  %s1375_s8 = sshll.u32 %s2152_s21, 7  ;;  %s1497_s24 = sshll.u32 %s1994_s18, 11 }
  0x43   : > { %v1801_v1 = vld [vmem:[#allocation6 + $0x38] sm:$0xff]   ;;  %1593 = vmatprep.subr.bf16.mxu0 %v1800_v0  ;;  %1705 = vmatprep.subr.bf16.mxu1 %v1800_v0  ;;  %v1803_v3 = vld [vmem:[#allocation6 + $0x30] sm:$0xff]   ;;  %v1804_v4 = vld [vmem:[#allocation6 + $0x68] sm:$0xff]   ;;  %s2219_s9 = scalar_lea.vmem [#allocation8], %s1375_s8  ;;  %s2294_s29 = scalar_lea.hbm %s2349_s4, %s1497_s24 }
  0x44   : > { %1594 = vmatpush3.bf16.msra.mxu0 %v1801_v1  ;;  %1713 = vmatpush3.bf16.msra.mxu1 %v1801_v1  ;;  %v1805_v5 = vld [vmem:[#allocation6 + $0x28] sm:$0xff]   ;;  %v1806_v6 = vld [vmem:[#allocation6 + $0x60] sm:$0xff]   ;;  %v1808_v8 = vld [vmem:[#allocation6 + $0x58] sm:$0xff]   ;;  %s1234_s10 = sshll.u32 %s2219_s9, 4  ;;  %s1220_s18 = scalar_lea.sflag [#allocation5], %s2152_s21  ;;  %s2296_s10 = int_to_ptr.vmem [resolvable:$true] %s1234_s10 }
  0x45   : > { %1595 = vmatprep.subr.bf16.mxu0 %v1802_v2  ;;  %1706 = vmatprep.subr.bf16.mxu1 %v1802_v2  ;;  %v1807_v7 = vld [vmem:[#allocation6 + $0x20] sm:$0xff]   ;;  %v1809_v9 = vld [vmem:[#allocation6 + $0x18] sm:$0xff]   ;;  %v1810_v10 = vld [vmem:[#allocation6 + $0x50] sm:$0xff]   ;;  %s1918_s12 = scalar_lea.vmem %s2296_s10, 2048  ;;  %p2362_p4 = scmp.ne.s32.totalorder %s2360_s13, 0 }
  0x46   : > { %v1818_v11 = vld [vmem:[%s2156_s6 + $0x4] ss:$8 sps:$4 sm:$0xff]   ;;  %v1811_v13 = vld [vmem:[#allocation6 + $0x10] sm:$0xff]   ;;  %v1816_v18 = vld [vmem:[%s2156_s6] ss:$8 sps:$4 sm:$0xff]   ;;  %p1919_p1 = scmp.ne.s32.totalorder %s2296_s10, %s1918_s12  ;;  %s2010_s22 = smov [#allocation8]  }
  0x47   : > { %v1821_v12 = vld [vmem:[%s2156_s6 + $0x84] ss:$8 sps:$4 sm:$0xff]   ;;  %721 = vmatprep.mubr.bf16.mxu0 %v1818_v11  ;;  %v1819_v19 = vld [vmem:[%s2156_s6 + $0x80] ss:$8 sps:$4 sm:$0xff]   ;;  %v1822_v20 = vld [vmem:[%s2156_s6 + $0x14] ss:$8 sps:$4 sm:$0xff]  }
  0x48   : > { %1596 = vmatpush3.bf16.msra.mxu0 %v1803_v3  ;;  %1714 = vmatpush3.bf16.msra.mxu1 %v1803_v3  ;;  %v1812_v14 = vld [vmem:[#allocation6 + $0x48] sm:$0xff]   ;;  %v1814_v16 = vld [vmem:[#allocation6 + $0x40] sm:$0xff]   ;;  %v1824_v21 = vld [vmem:[%s2156_s6 + $0x94] ss:$8 sps:$4 sm:$0xff]   ;;  %p1920_p8 = pnand %p1919_p1, %p2362_p4  ;;  %s1922_s30 = sshll.u32 %s2010_s22, 4  ;;  %s1923_s30 = int_to_ptr.vmem [resolvable:$false] %s1922_s30 }
  0x49   : > { %1597 = vmatprep.subr.bf16.mxu0 %v1804_v4  ;;  %1707 = vmatprep.subr.bf16.mxu1 %v1804_v4  ;;  %v1813_v15 = vld [vmem:[#allocation6 + $0x8] sm:$0xff]   ;;  %v1815_v17 = vld [vmem:[#allocation6] sm:$0xff]   ;;  %v1826_v22 = vld [vmem:[%s2156_s6 + $0x10] ss:$8 sps:$4 sm:$0xff]   ;;  %s1924_s1 = scalar_lea.vmem %s1923_s30, 4096  ;;  %p1925_p13 = scmp.lt.s32.totalorder %s2296_s10, %s1923_s30 }
  0x4a   : > { %785 = vmatprep.mubr.bf16.mxu1 %v1821_v12  ;;  %v1827_v23 = vld [vmem:[%s2156_s6 + $0x90] ss:$8 sps:$4 sm:$0xff]   ;;  %v1828_v24 = vld [vmem:[%s2156_s6 + $0x24] ss:$8 sps:$4 sm:$0xff]   ;;  %v1832_v26 = vld [vmem:[%s2156_s6 + $0x20] ss:$8 sps:$4 sm:$0xff]   ;;  %p1921_p12 = pneg %p1920_p8  ;;  %p1926_p0 = scmp.lt.s32.totalorder %s1924_s1, %s1918_s12 }
  0x4b   : > { %v1830_v25 = vld [vmem:[%s2156_s6 + $0xa4] ss:$8 sps:$4 sm:$0xff]   ;;  %v1833_v27 = vld [vmem:[%s2156_s6 + $0xa0] ss:$8 sps:$4 sm:$0xff]   ;;  %v1834_v28 = vld [vmem:[%s2156_s6 + $0x34] ss:$8 sps:$4 sm:$0xff]  }
  0x4c   : > { %1598 = vmatpush3.bf16.msra.mxu0 %v1805_v5  ;;  %1715 = vmatpush3.bf16.msra.mxu1 %v1805_v5  ;;  %v1836_v29 = vld [vmem:[%s2156_s6 + $0xb4] ss:$8 sps:$4 sm:$0xff]   ;;  %v1838_v30 = vld [vmem:[%s2156_s6 + $0x30] ss:$8 sps:$4 sm:$0xff]   ;;  %v1840_v32 = vld [vmem:[%s2156_s6 + $0x44] ss:$8 sps:$4 sm:$0xff]   ;;  %p1927_p2 = por %p1926_p0, %p1925_p13 }
  0x4d   : > { %1599 = vmatprep.subr.bf16.mxu0 %v1806_v6  ;;  %1708 = vmatprep.subr.bf16.mxu1 %v1806_v6  ;;  %v1839_v31 = vld [vmem:[%s2156_s6 + $0xb0] ss:$8 sps:$4 sm:$0xff]   ;;  %v1842_v33 = vld [vmem:[%s2156_s6 + $0xc4] ss:$8 sps:$4 sm:$0xff]   ;;  %v1844_v34 = vld [vmem:[%s2156_s6 + $0x40] ss:$8 sps:$4 sm:$0xff]  }
  0x4e   : > { %v1845_v35 = vld [vmem:[%s2156_s6 + $0xc0] ss:$8 sps:$4 sm:$0xff]   ;;  %v1846_v36 = vld [vmem:[%s2156_s6 + $0x54] ss:$8 sps:$4 sm:$0xff]   ;;  %v1850_v38 = vld [vmem:[%s2156_s6 + $0x50] ss:$8 sps:$4 sm:$0xff]   ;;  %p1928_p3 = pnand %p1927_p2, %p1921_p12 }
  0x4f   : > { %v1848_v37 = vld [vmem:[%s2156_s6 + $0xd4] ss:$8 sps:$4 sm:$0xff]   ;;  %v1851_v39 = vld [vmem:[%s2156_s6 + $0xd0] ss:$8 sps:$4 sm:$0xff]   ;;  %v1852_v40 = vld [vmem:[%s2156_s6 + $0x64] ss:$8 sps:$4 sm:$0xff]  }
  0x50   : > { %1600 = vmatpush3.bf16.msra.mxu0 %v1807_v7  ;;  %1716 = vmatpush3.bf16.msra.mxu1 %v1807_v7  ;;  %v1854_v41 = vld [vmem:[%s2156_s6 + $0xe4] ss:$8 sps:$4 sm:$0xff]   ;;  %v1856_v42 = vld [vmem:[%s2156_s6 + $0x60] ss:$8 sps:$4 sm:$0xff]   ;;  %v1858_v44 = vld [vmem:[%s2156_s6 + $0x74] ss:$8 sps:$4 sm:$0xff]  }
  0x51   : > { %1601 = vmatprep.subr.bf16.mxu0 %v1808_v8  ;;  %1709 = vmatprep.subr.bf16.mxu1 %v1808_v8  ;;  %v1857_v43 = vld [vmem:[%s2156_s6 + $0xe0] ss:$8 sps:$4 sm:$0xff]   ;;  %v1860_v45 = vld [vmem:[%s2156_s6 + $0xf4] ss:$8 sps:$4 sm:$0xff]   ;;  %v1862_v46 = vld [vmem:[%s2156_s6 + $0x70] ss:$8 sps:$4 sm:$0xff]  }
  0x52   : > { %v1863_v47 = vld [vmem:[%s2156_s6 + $0xf0] ss:$8 sps:$4 sm:$0xff]   ;;  %v2201_v51 = vld [vmem:[%s2347_s2] ss:$0 sm:$0xff] }
  0x53   : > { %v2208_v59 = vld [vmem:[%s2348_s3] ss:$0 sm:$0xff] }
  0x54   : > { %1602 = vmatpush3.bf16.msra.mxu0 %v1809_v9  ;;  %1717 = vmatpush3.bf16.msra.mxu1 %v1809_v9 }
  0x55   : > { %1603 = vmatprep.subr.bf16.mxu0 %v1810_v10  ;;  %1710 = vmatprep.subr.bf16.mxu1 %v1810_v10 }
  0x58   : > { %1604 = vmatpush3.bf16.msra.mxu0 %v1811_v13  ;;  %1718 = vmatpush3.bf16.msra.mxu1 %v1811_v13 }
  0x59   : > { %1605 = vmatprep.subr.bf16.mxu0 %v1812_v14  ;;  %1711 = vmatprep.subr.bf16.mxu1 %v1812_v14 }
  0x5c   : > { %1606 = vmatpush3.bf16.msra.mxu0 %v1813_v15  ;;  %1719 = vmatpush3.bf16.msra.mxu1 %v1813_v15 }
  0x5d   : > { %1607 = vmatprep.subr.bf16.mxu0 %v1814_v16  ;;  %1712 = vmatprep.subr.bf16.mxu1 %v1814_v16 }
  0x60   : > { %1608 = vmatpush3.bf16.msra.mxu0 %v1815_v17  ;;  %1720 = vmatpush3.bf16.msra.mxu1 %v1815_v17 }
  0x63   : > { %722 = vmatmul.mubr.bf16.vlgmr.msra.gmra.mxu0 %v1816_v18  ;;  %786 = vmatmul.mubr.bf16.vlgmr.msra.gmra.mxu1 %v1819_v19 }
  0x64   : > { %729 = vmatprep.mubr.bf16.mxu0 %v1822_v20  ;;  %793 = vmatprep.mubr.bf16.mxu1 %v1824_v21 }
  0x6b   : > { %730 = vmatmul.mubr.bf16.gmra.mxu0 %v1826_v22  ;;  %794 = vmatmul.mubr.bf16.gmra.mxu1 %v1827_v23 }
  0x6c   : > { %737 = vmatprep.mubr.bf16.mxu0 %v1828_v24  ;;  %801 = vmatprep.mubr.bf16.mxu1 %v1830_v25 }
  0x73   : > { %738 = vmatmul.mubr.bf16.gmra.mxu0 %v1832_v26  ;;  %802 = vmatmul.mubr.bf16.gmra.mxu1 %v1833_v27 }
  0x74   : > { %745 = vmatprep.mubr.bf16.mxu0 %v1834_v28  ;;  %809 = vmatprep.mubr.bf16.mxu1 %v1836_v29 }
  0x7b   : > { %746 = vmatmul.mubr.bf16.gmra.mxu0 %v1838_v30  ;;  %810 = vmatmul.mubr.bf16.gmra.mxu1 %v1839_v31 }
  0x7c   : > { %753 = vmatprep.mubr.bf16.mxu0 %v1840_v32  ;;  %817 = vmatprep.mubr.bf16.mxu1 %v1842_v33 }
  0x83   : > { %754 = vmatmul.mubr.bf16.gmra.mxu0 %v1844_v34  ;;  %818 = vmatmul.mubr.bf16.gmra.mxu1 %v1845_v35 }
  0x84   : > { %761 = vmatprep.mubr.bf16.mxu0 %v1846_v36  ;;  %825 = vmatprep.mubr.bf16.mxu1 %v1848_v37 }
  0x8b   : > { %762 = vmatmul.mubr.bf16.gmra.mxu0 %v1850_v38  ;;  %826 = vmatmul.mubr.bf16.gmra.mxu1 %v1851_v39 }
  0x8c   : > { %769 = vmatprep.mubr.bf16.mxu0 %v1852_v40  ;;  %833 = vmatprep.mubr.bf16.mxu1 %v1854_v41 }
  0x93   : > { %770 = vmatmul.mubr.bf16.gmra.mxu0 %v1856_v42  ;;  %834 = vmatmul.mubr.bf16.gmra.mxu1 %v1857_v43 }
  0x94   : > { %777 = vmatprep.mubr.bf16.mxu0 %v1858_v44  ;;  %841 = vmatprep.mubr.bf16.mxu1 %v1860_v45 }
  0x9b   : > { %778 = vmatmul.mubr.bf16.gmra.mxu0 %v1862_v46  ;;  %842 = vmatmul.mubr.bf16.gmra.mxu1 %v1863_v47 }
 0x123   : > { %v1609_v48 = vpop.f32.mrf.mxu0  ;;  %v1657_v49 = vpop.f32.mrf.mxu1 }
 0x125   : > { %v1610_v50 = vpop.f32.mrf.mxu0  ;;  %v1658_v52 = vpop.f32.mrf.mxu1 }
 0x126   : > { %v1611_v53 = vadd.f32 %v1610_v50, %v1609_v48  ;;  %v1659_v54 = vadd.f32 %v1658_v52, %v1657_v49 }
 0x127   : > { %v1612_v55 = vpop.f32.mrf.mxu0  ;;  %v1660_v56 = vpop.f32.mrf.mxu1 }
 0x128   : > { %v956_v57 = vmul.f32 %v1611_v53, %v2201_v51  ;;  %v972_v58 = vmul.f32 %v1659_v54, %v2201_v51 }
 0x129   : > { %v1613_v60 = vpop.f32.mrf.mxu0  ;;  %v1661_v61 = vpop.f32.mrf.mxu1 }
 0x12a   : > { %v1614_v62 = vadd.f32 %v1613_v60, %v1612_v55  ;;  %v1662_v63 = vadd.f32 %v1661_v61, %v1660_v56  ;;  %v995_v2 = vadd.f32 %v2208_v59, %v956_v57  ;;  %v1011_v3 = vadd.f32 %v2208_v59, %v972_v58 }
 0x12b   : > { %v1615_v0 = vpop.f32.mrf.mxu0  ;;  %v1663_v1 = vpop.f32.mrf.mxu1 }
 0x12c   : > { %v957_v4 = vmul.f32 %v1614_v62, %v2201_v51  ;;  %v973_v5 = vmul.f32 %v1662_v63, %v2201_v51  ;;  %v1027_v14 = vmax.f32 %v995_v2, 0.0  ;;  %v1043_v15 = vmax.f32 %v1011_v3, 0.0 }
 0x12d   : > { %v1616_v6 = vpop.f32.mrf.mxu0  ;;  %v1664_v7 = vpop.f32.mrf.mxu1 }
 0x12e   : > { %v996_v8 = vadd.f32 %v2208_v59, %v957_v4  ;;  %v1012_v9 = vadd.f32 %v2208_v59, %v973_v5  ;;  %v1617_v10 = vadd.f32 %v1616_v6, %v1615_v0  ;;  %v1665_v11 = vadd.f32 %v1664_v7, %v1663_v1 }
 0x12f   : > { %v1618_v12 = vpop.f32.mrf.mxu0  ;;  %v1666_v13 = vpop.f32.mrf.mxu1 }
 0x130   : > { %v1028_v16 = vmax.f32 %v996_v8, 0.0  ;;  %v1044_v17 = vmax.f32 %v1012_v9, 0.0  ;;  %v958_v18 = vmul.f32 %v1617_v10, %v2201_v51  ;;  %v974_v19 = vmul.f32 %v1665_v11, %v2201_v51 }
 0x131   : > { %v1619_v20 = vpop.f32.mrf.mxu0  ;;  %v1667_v21 = vpop.f32.mrf.mxu1 }
 0x132   : > { %v1501_v22 = vpack.c.bf16 %v1028_v16, %v1027_v14  ;;  %v1541_v23 = vpack.c.bf16 %v1044_v17, %v1043_v15  ;;  %v1620_v24 = vadd.f32 %v1619_v20, %v1618_v12  ;;  %v1668_v25 = vadd.f32 %v1667_v21, %v1666_v13 }
 0x133   : > { %v1621_v26 = vpop.f32.mrf.mxu0  ;;  %v1669_v27 = vpop.f32.mrf.mxu1  ;;  %v997_v28 = vadd.f32 %v2208_v59, %v958_v18  ;;  %v1013_v29 = vadd.f32 %v2208_v59, %v974_v19 }
 0x134   : > { %1502 = vst [vmem:[%s2219_s9] sm:$0xff] %v1501_v22   ;;  %1585 = vst [vmem:[%s2219_s9 + $0x40] sm:$0xff] %v1541_v23   ;;  %v959_v30 = vmul.f32 %v1620_v24, %v2201_v51  ;;  %v975_v31 = vmul.f32 %v1668_v25, %v2201_v51 }
 0x135   : > { %v1622_v32 = vpop.f32.mrf.mxu0  ;;  %v1670_v33 = vpop.f32.mrf.mxu1  ;;  %v1029_v42 = vmax.f32 %v997_v28, 0.0  ;;  %v1045_v43 = vmax.f32 %v1013_v29, 0.0 }
 0x136   : > { %v1623_v34 = vadd.f32 %v1622_v32, %v1621_v26  ;;  %v1671_v35 = vadd.f32 %v1670_v33, %v1669_v27  ;;  %v998_v36 = vadd.f32 %v2208_v59, %v959_v30  ;;  %v1014_v37 = vadd.f32 %v2208_v59, %v975_v31 }
 0x137   : > { %v1624_v38 = vpop.f32.mrf.mxu0  ;;  %v1672_v39 = vpop.f32.mrf.mxu1 }
 0x138   : > { %v960_v40 = vmul.f32 %v1623_v34, %v2201_v51  ;;  %v976_v41 = vmul.f32 %v1671_v35, %v2201_v51  ;;  %v1030_v44 = vmax.f32 %v998_v36, 0.0  ;;  %v1046_v45 = vmax.f32 %v1014_v37, 0.0 }
 0x139   : > { %v1625_v46 = vpop.f32.mrf.mxu0  ;;  %v1673_v47 = vpop.f32.mrf.mxu1 }
 0x13a   : > { %v1626_v48 = vadd.f32 %v1625_v46, %v1624_v38  ;;  %v1674_v49 = vadd.f32 %v1673_v47, %v1672_v39  ;;  %v1506_v50 = vpack.c.bf16 %v1030_v44, %v1029_v42  ;;  %v1546_v52 = vpack.c.bf16 %v1046_v45, %v1045_v43 }
 0x13b   : > { %v1627_v53 = vpop.f32.mrf.mxu0  ;;  %v1675_v54 = vpop.f32.mrf.mxu1  ;;  %v999_v55 = vadd.f32 %v2208_v59, %v960_v40  ;;  %v1015_v56 = vadd.f32 %v2208_v59, %v976_v41 }
 0x13c   : > { %v961_v57 = vmul.f32 %v1626_v48, %v2201_v51  ;;  %v977_v58 = vmul.f32 %v1674_v49, %v2201_v51  ;;  %1578 = vst [vmem:[%s2219_s9 + $0x8] sm:$0xff] %v1506_v50   ;;  %1586 = vst [vmem:[%s2219_s9 + $0x48] sm:$0xff] %v1546_v52  }
 0x13d   : > { %v1628_v60 = vpop.f32.mrf.mxu0  ;;  %v1676_v61 = vpop.f32.mrf.mxu1  ;;  %v1031_v4 = vmax.f32 %v999_v55, 0.0  ;;  %v1047_v5 = vmax.f32 %v1015_v56, 0.0 }
 0x13e   : > { %v1000_v62 = vadd.f32 %v2208_v59, %v961_v57  ;;  %v1016_v63 = vadd.f32 %v2208_v59, %v977_v58  ;;  %v1629_v0 = vadd.f32 %v1628_v60, %v1627_v53  ;;  %v1677_v1 = vadd.f32 %v1676_v61, %v1675_v54 }
 0x13f   : > { %v1630_v2 = vpop.f32.mrf.mxu0  ;;  %v1678_v3 = vpop.f32.mrf.mxu1 }
 0x140   : > { %v1032_v6 = vmax.f32 %v1000_v62, 0.0  ;;  %v1048_v7 = vmax.f32 %v1016_v63, 0.0  ;;  %v962_v8 = vmul.f32 %v1629_v0, %v2201_v51  ;;  %v978_v9 = vmul.f32 %v1677_v1, %v2201_v51 }
 0x141   : > { %v1631_v10 = vpop.f32.mrf.mxu0  ;;  %v1679_v11 = vpop.f32.mrf.mxu1 }
 0x142   : > { %v1511_v12 = vpack.c.bf16 %v1032_v6, %v1031_v4  ;;  %v1551_v13 = vpack.c.bf16 %v1048_v7, %v1047_v5  ;;  %v1632_v14 = vadd.f32 %v1631_v10, %v1630_v2  ;;  %v1680_v15 = vadd.f32 %v1679_v11, %v1678_v3 }
 0x143   : > { %v1633_v16 = vpop.f32.mrf.mxu0  ;;  %v1681_v17 = vpop.f32.mrf.mxu1  ;;  %v1001_v18 = vadd.f32 %v2208_v59, %v962_v8  ;;  %v1017_v19 = vadd.f32 %v2208_v59, %v978_v9 }
 0x144   : > { %1579 = vst [vmem:[%s2219_s9 + $0x10] sm:$0xff] %v1511_v12   ;;  %1587 = vst [vmem:[%s2219_s9 + $0x50] sm:$0xff] %v1551_v13   ;;  %v963_v20 = vmul.f32 %v1632_v14, %v2201_v51  ;;  %v979_v21 = vmul.f32 %v1680_v15, %v2201_v51 }
 0x145   : > { %v1634_v22 = vpop.f32.mrf.mxu0  ;;  %v1682_v23 = vpop.f32.mrf.mxu1  ;;  %v1033_v32 = vmax.f32 %v1001_v18, 0.0  ;;  %v1049_v33 = vmax.f32 %v1017_v19, 0.0 }
 0x146   : > { %v1635_v24 = vadd.f32 %v1634_v22, %v1633_v16  ;;  %v1683_v25 = vadd.f32 %v1682_v23, %v1681_v17  ;;  %v1002_v26 = vadd.f32 %v2208_v59, %v963_v20  ;;  %v1018_v27 = vadd.f32 %v2208_v59, %v979_v21 }
 0x147   : > { %v1636_v28 = vpop.f32.mrf.mxu0  ;;  %v1684_v29 = vpop.f32.mrf.mxu1 }
 0x148   : > { %v964_v30 = vmul.f32 %v1635_v24, %v2201_v51  ;;  %v980_v31 = vmul.f32 %v1683_v25, %v2201_v51  ;;  %v1034_v34 = vmax.f32 %v1002_v26, 0.0  ;;  %v1050_v35 = vmax.f32 %v1018_v27, 0.0 }
 0x149   : > { %v1637_v36 = vpop.f32.mrf.mxu0  ;;  %v1685_v37 = vpop.f32.mrf.mxu1 }
 0x14a   : > { %v1638_v38 = vadd.f32 %v1637_v36, %v1636_v28  ;;  %v1686_v39 = vadd.f32 %v1685_v37, %v1684_v29  ;;  %v1516_v40 = vpack.c.bf16 %v1034_v34, %v1033_v32  ;;  %v1556_v41 = vpack.c.bf16 %v1050_v35, %v1049_v33 }
 0x14b   : > { %v1639_v42 = vpop.f32.mrf.mxu0  ;;  %v1687_v43 = vpop.f32.mrf.mxu1  ;;  %v1003_v44 = vadd.f32 %v2208_v59, %v964_v30  ;;  %v1019_v45 = vadd.f32 %v2208_v59, %v980_v31 }
 0x14c   : > { %v965_v46 = vmul.f32 %v1638_v38, %v2201_v51  ;;  %v981_v47 = vmul.f32 %v1686_v39, %v2201_v51  ;;  %1580 = vst [vmem:[%s2219_s9 + $0x18] sm:$0xff] %v1516_v40   ;;  %1588 = vst [vmem:[%s2219_s9 + $0x58] sm:$0xff] %v1556_v41  }
 0x14d   : > { %v1640_v48 = vpop.f32.mrf.mxu0  ;;  %v1688_v49 = vpop.f32.mrf.mxu1  ;;  %v1035_v57 = vmax.f32 %v1003_v44, 0.0  ;;  %v1051_v58 = vmax.f32 %v1019_v45, 0.0 }
 0x14e   : > { %v1004_v50 = vadd.f32 %v2208_v59, %v965_v46  ;;  %v1020_v52 = vadd.f32 %v2208_v59, %v981_v47  ;;  %v1641_v53 = vadd.f32 %v1640_v48, %v1639_v42  ;;  %v1689_v54 = vadd.f32 %v1688_v49, %v1687_v43 }
 0x14f   : > { %v1642_v55 = vpop.f32.mrf.mxu0  ;;  %v1690_v56 = vpop.f32.mrf.mxu1 }
 0x150   : > { %v1036_v60 = vmax.f32 %v1004_v50, 0.0  ;;  %v1052_v61 = vmax.f32 %v1020_v52, 0.0  ;;  %v966_v62 = vmul.f32 %v1641_v53, %v2201_v51  ;;  %v982_v63 = vmul.f32 %v1689_v54, %v2201_v51 }
 0x151   : > { %v1643_v0 = vpop.f32.mrf.mxu0  ;;  %v1691_v1 = vpop.f32.mrf.mxu1 }
 0x152   : > { %v1521_v2 = vpack.c.bf16 %v1036_v60, %v1035_v57  ;;  %v1561_v3 = vpack.c.bf16 %v1052_v61, %v1051_v58  ;;  %v1644_v4 = vadd.f32 %v1643_v0, %v1642_v55  ;;  %v1692_v5 = vadd.f32 %v1691_v1, %v1690_v56 }
 0x153   : > { %v1645_v6 = vpop.f32.mrf.mxu0  ;;  %v1693_v7 = vpop.f32.mrf.mxu1  ;;  %v1005_v8 = vadd.f32 %v2208_v59, %v966_v62  ;;  %v1021_v9 = vadd.f32 %v2208_v59, %v982_v63 }
 0x154   : > { %1581 = vst [vmem:[%s2219_s9 + $0x20] sm:$0xff] %v1521_v2   ;;  %1589 = vst [vmem:[%s2219_s9 + $0x60] sm:$0xff] %v1561_v3   ;;  %v967_v10 = vmul.f32 %v1644_v4, %v2201_v51  ;;  %v983_v11 = vmul.f32 %v1692_v5, %v2201_v51 }
 0x155   : > { %v1646_v12 = vpop.f32.mrf.mxu0  ;;  %v1694_v13 = vpop.f32.mrf.mxu1  ;;  %v1037_v22 = vmax.f32 %v1005_v8, 0.0  ;;  %v1053_v23 = vmax.f32 %v1021_v9, 0.0 }
 0x156   : > { %v1647_v14 = vadd.f32 %v1646_v12, %v1645_v6  ;;  %v1695_v15 = vadd.f32 %v1694_v13, %v1693_v7  ;;  %v1006_v16 = vadd.f32 %v2208_v59, %v967_v10  ;;  %v1022_v17 = vadd.f32 %v2208_v59, %v983_v11 }
 0x157   : > { %v1648_v18 = vpop.f32.mrf.mxu0  ;;  %v1696_v19 = vpop.f32.mrf.mxu1 }
 0x158   : > { %v968_v20 = vmul.f32 %v1647_v14, %v2201_v51  ;;  %v984_v21 = vmul.f32 %v1695_v15, %v2201_v51  ;;  %v1038_v24 = vmax.f32 %v1006_v16, 0.0  ;;  %v1054_v25 = vmax.f32 %v1022_v17, 0.0 }
 0x159   : > { %v1649_v26 = vpop.f32.mrf.mxu0  ;;  %v1697_v27 = vpop.f32.mrf.mxu1 }
 0x15a   : > { %v1650_v28 = vadd.f32 %v1649_v26, %v1648_v18  ;;  %v1698_v29 = vadd.f32 %v1697_v27, %v1696_v19  ;;  %v1526_v30 = vpack.c.bf16 %v1038_v24, %v1037_v22  ;;  %v1566_v31 = vpack.c.bf16 %v1054_v25, %v1053_v23 }
 0x15b   : > { %v1651_v32 = vpop.f32.mrf.mxu0  ;;  %v1699_v33 = vpop.f32.mrf.mxu1  ;;  %v1007_v34 = vadd.f32 %v2208_v59, %v968_v20  ;;  %v1023_v35 = vadd.f32 %v2208_v59, %v984_v21 }
 0x15c   : > { %v969_v36 = vmul.f32 %v1650_v28, %v2201_v51  ;;  %v985_v37 = vmul.f32 %v1698_v29, %v2201_v51  ;;  %1582 = vst [vmem:[%s2219_s9 + $0x28] sm:$0xff] %v1526_v30   ;;  %1590 = vst [vmem:[%s2219_s9 + $0x68] sm:$0xff] %v1566_v31  }
 0x15d   : > { %v1652_v38 = vpop.f32.mrf.mxu0  ;;  %v1700_v39 = vpop.f32.mrf.mxu1  ;;  %v1039_v46 = vmax.f32 %v1007_v34, 0.0  ;;  %v1055_v47 = vmax.f32 %v1023_v35, 0.0 }
 0x15e   : > { %v1008_v40 = vadd.f32 %v2208_v59, %v969_v36  ;;  %v1024_v41 = vadd.f32 %v2208_v59, %v985_v37  ;;  %v1653_v42 = vadd.f32 %v1652_v38, %v1651_v32  ;;  %v1701_v43 = vadd.f32 %v1700_v39, %v1699_v33 }
 0x15f   : > { %v1654_v44 = vpop.f32.mrf.mxu0  ;;  %v1702_v45 = vpop.f32.mrf.mxu1 }
 0x160   : > { %v1040_v48 = vmax.f32 %v1008_v40, 0.0  ;;  %v1056_v49 = vmax.f32 %v1024_v41, 0.0  ;;  %v970_v50 = vmul.f32 %v1653_v42, %v2201_v51  ;;  %v986_v52 = vmul.f32 %v1701_v43, %v2201_v51 }
 0x161   : > { %v1655_v53 = vpop.f32.mrf.mxu0  ;;  %v1703_v54 = vpop.f32.mrf.mxu1 }
 0x162   : > { %v1531_v55 = vpack.c.bf16 %v1040_v48, %v1039_v46  ;;  %v1571_v56 = vpack.c.bf16 %v1056_v49, %v1055_v47  ;;  %v1656_v57 = vadd.f32 %v1655_v53, %v1654_v44  ;;  %v1704_v58 = vadd.f32 %v1703_v54, %v1702_v45 }
 0x163   : > { %v1009_v60 = vadd.f32 %v2208_v59, %v970_v50  ;;  %v1025_v61 = vadd.f32 %v2208_v59, %v986_v52 }
 0x164   : > { %1583 = vst [vmem:[%s2219_s9 + $0x30] sm:$0xff] %v1531_v55   ;;  %1591 = vst [vmem:[%s2219_s9 + $0x70] sm:$0xff] %v1571_v56   ;;  %v971_v62 = vmul.f32 %v1656_v57, %v2201_v51  ;;  %v987_v63 = vmul.f32 %v1704_v58, %v2201_v51 }
 0x165   : > { %v1041_v2 = vmax.f32 %v1009_v60, 0.0  ;;  %v1057_v3 = vmax.f32 %v1025_v61, 0.0 }
 0x166   : > { %v1010_v0 = vadd.f32 %v2208_v59, %v971_v62  ;;  %v1026_v1 = vadd.f32 %v2208_v59, %v987_v63 }
 0x168   : > { %v1042_v4 = vmax.f32 %v1010_v0, 0.0  ;;  %v1058_v5 = vmax.f32 %v1026_v1, 0.0 }
 0x16a   : > { %v1536_v51 = vpack.c.bf16 %v1042_v4, %v1041_v2  ;;  %v1576_v6 = vpack.c.bf16 %v1058_v5, %v1057_v3 }
 0x16c   : > { %1584 = vst [vmem:[%s2219_s9 + $0x38] sm:$0xff] %v1536_v51   ;;  %1592 = vst [vmem:[%s2219_s9 + $0x78] sm:$0xff] %v1576_v6  }
 0x16d   : > { %1931 = shalt.err (!%p1928_p3)
}
 0x16e   : > { %s1932_s6 = scalar_lea.hbm %s2294_s29, 2048  ;;  %s1936_s27 = scalar_lea.hbm %s2349_s4, 16384 }
 0x16f   : > { %p1933_p5 = scmp.ne.s32.totalorder %s2294_s29, %s1932_s6  ;;  %p1937_p6 = scmp.lt.s32.totalorder %s2294_s29, %s2349_s4 }
 0x170   : > { %p1938_p11 = scmp.lt.s32.totalorder %s1936_s27, %s1932_s6 }
 0x171   : > { %p1934_p7 = pnand %p1933_p5, %p2362_p4 }
 0x172   : > { %p1939_p10 = por %p1938_p11, %p1937_p6 }
 0x173   : > { %p1935_p9 = pneg %p1934_p7 }
 0x175   : > { %p1940_p1 = pnand %p1939_p10, %p1935_p9 }
 0x177   : > { %1943 = shalt.err (!%p1940_p1)
}
 0x178   : > { %s2011_s9 = smov 64   ;;  %s2012_s24 = smov 4  }
 0x179   : > { %1727 = dma.vmem_to_hbm [thread:$0]  (%p2362_p4), %s2296_s10, 2048, %s2294_s29, %s1220_s18, %s2011_s9, %s2011_s9, %s2012_s24  }
 0x17a PF: > { %p1744_p8 = scmp.ge.s32.totalorder %s2002_s20, 2  ;;  %s1249_s14 = sand.u32 1, %s1982_s15  }
 0x17b   : > { %p2363_p12 = scmp.ne.s32.totalorder %s2355_s26, 0  ;;  %s1250_s11 = scalar_lea.sflag [#allocation5], %s1249_s14 }
 0x17d   : > { %p1738_p13 = pnand %p1744_p8, %p2363_p12 }
 0x17f   : > { %p1739_p0 = pneg %p1738_p13 }
 0x181   : > { %1977 = dma.done.wait (%p1739_p0), %s1250_s11, 2048  }
 0x182   : > { %1979 = vsyncadd (%p1739_p0), %s1250_s11, 4294965248  ;;  %s21_s20 = sadd.s32 1, %s2002_s20   ;;  %s2364_s15 = smov %s1986_s16 }
 0x183   : > { %p18_p2 = scmp.ge.s32.totalorder %s21_s20, 10   ;;  %s2365_s16 = smov %s1990_s17 }
 0x184   : > { %s2366_s17 = smov %s2133_s28  ;;  %s2367_s18 = smov %s1998_s19 }
 0x185   : > { %s2368_s19 = smov %s2370_s5  ;;  %20 = sbr.rel (!%p18_p2) target bundleno = 9 (0x9), region = 100 }
 0x18a   :  { %1255 = vsyncpa [#allocation4], 1 }
 0x18b   :  { %1257 = vsyncpa [#allocation4 + $0x1], 1 }
 0x18c   :  { %1258 = vsyncpa [#allocation7], 1 }
 0x18d   :  { %1259 = vsyncpa [#allocation5], 1 }
 0x18e   :  { %1261 = vsyncpa [#allocation5 + $0x1], 1 }

</bundles_post_ra>
